<compile_context>
chip_gen: v7x
topology: tpu7x:2x2x1
jax: 0.10.0
libtpu: 0.0.40
codegen_flags: <defaults>
</compile_context>

<pallas_src>
import functools

import jax
import jax.numpy as jnp
from jax.experimental import pallas as pl
from jax.experimental.pallas import tpu as pltpu


def _st_gcn_kernel(alphas_ref, xbd_ref, abd_ref, xr_ref,
                   wbig_ref, wband_ref, rp_ref, out_ref):
    # Per grid step (one group of NB samples):
    #   xbd_ref  : (T*C,    NB*T*V)  x, block-diag over t          (rows = (t,c))
    #   abd_ref  : (NB*T*V, NB*V)    A, block-diag over samples    (cols = (n,w))
    #   xr_ref   : (T*C,    NB*V)    x in (t,c)x(n,v) layout (skip connection / residual)
    #   wbig_ref : (2*T*Co, T*C)     [W0^T ; W1^T], each block-diag over t
    #   wband_ref: (T*Co,   T*Co)    temporal conv as block-Toeplitz, BN2 folded in
    #   rp_ref   : (T*Co, 3)         per-row [bn1_scale, bn1_shift, conv_bias (+BN2 shift)]
    #   alphas   : (2,) in SMEM      [prelu1_alpha, final_prelu_alpha]
    t_co = wband_ref.shape[0]

    # ---- GCN: one matmul for x@A (all samples, all T), one matmul for both W layers ----
    xa = jnp.dot(xbd_ref[...], abd_ref[...],
                 preferred_element_type=jnp.float32)            # (T*C, NB*V)
    h = jnp.dot(wbig_ref[...], xa,
                preferred_element_type=jnp.float32)             # (2*T*Co, NB*V)
    x_res = xr_ref[...]
    gcn = (jnp.maximum(h[:t_co, :], 0.0) +
           jnp.maximum(h[t_co:, :], 0.0) + x_res)               # (T*Co, NB*V)

    # ---- TCN: BN1 (folded scale/shift) -> PReLU -> temporal conv (+BN2, folded) ----
    a1 = alphas_ref[0]
    a2 = alphas_ref[1]
    y = gcn * rp_ref[:, 0:1] + rp_ref[:, 1:2]
    y = jnp.where(y >= 0.0, y, a1 * y)
    conv = jnp.dot(wband_ref[...], y,
                   preferred_element_type=jnp.float32) + rp_ref[:, 2:3]

    # ---- identity residual + final PReLU ----
    z = conv + x_res
    out_ref[...] = jnp.where(z >= 0.0, z, a2 * z)


@functools.partial(jax.jit, static_argnames=("nb", "eps"))
def st_gcn_forward(x, A, w0, w1, conv_w, conv_b, bn1, bn2, a1, a2, nb=None, eps=1e-5):
    N, C, T, V = x.shape
    Co = w1.shape[-1]
    kt = conv_w.shape[-1]
    pad = (kt - 1) // 2
    assert C == Co, "identity residual path requires in_channels == out_channels"
    if nb is None:
        nb = N
    assert N % nb == 0
    G = N // nb

    f32 = jnp.float32
    x = x.astype(f32)
    A = A.astype(f32)

    gamma1, beta1, mean1, var1 = bn1
    gamma2, beta2, mean2, var2 = bn2
    inv1 = gamma1 / jnp.sqrt(var1 + eps)
    inv2 = gamma2 / jnp.sqrt(var2 + eps)

    # ---------- zero-FLOP layout plumbing (block-diag / Toeplitz packing) ----------
    eye_t = jnp.eye(T, dtype=f32)
    eye_n = jnp.eye(nb, dtype=f32)

    xg = x.reshape(G, nb, C, T, V)
    # x block-diag over t: rows (t,c), cols (n,t',v)
    xbd = jnp.einsum('gjctv,ts->gtcjsv', xg, eye_t).reshape(G, T * C, nb * T * V)
    # A block-diag over samples: rows (n,t,v), cols (n',w)
    abd = jnp.einsum('gjtvw,jk->gjtvkw', A.reshape(G, nb, T, V, V),
                     eye_n).reshape(G, nb * T * V, nb * V)
    # x in (t,c) x (n,v) layout (skip connection + residual add)
    xr = jnp.transpose(xg, (0, 3, 2, 1, 4)).reshape(G, T * C, nb * V)

    # Stacked + block-diag GCN weight: rows (layer, t, h), cols (t', c)
    w0b = jnp.einsum('tch,ts->thsc', w0.astype(f32), eye_t).reshape(T * Co, T * C)
    w1b = jnp.einsum('tch,ts->thsc', w1.astype(f32), eye_t).reshape(T * Co, T * C)
    wbig = jnp.concatenate([w0b, w1b], axis=0)                        # (2*T*Co, T*C)

    # Temporal conv as one block-Toeplitz matmul, BN2 scale folded into the weight.
    cwf = jnp.einsum('ocd,o->doc', conv_w.astype(f32), inv2)          # (kt, Co, Co)
    tt = jnp.arange(T)
    d = tt[None, :] - tt[:, None] + pad                               # tap index per (t_out, t_in)
    valid = ((d >= 0) & (d < kt)).astype(f32)
    blocks = cwf[jnp.clip(d, 0, kt - 1)] * valid[:, :, None, None]    # (T, T, Co, Co)
    wband = jnp.transpose(blocks, (0, 2, 1, 3)).reshape(T * Co, T * Co)

    # Per-row affine params: [bn1 scale, bn1 shift, conv bias + BN2 shift], tiled over t.
    rp = jnp.stack([jnp.tile(inv1, T),
                    jnp.tile(beta1 - mean1 * inv1, T),
                    jnp.tile(conv_b * inv2 + beta2 - mean2 * inv2, T)],
                   axis=1).astype(f32)                                # (T*Co, 3)

    alphas = jnp.stack([jnp.asarray(a1, f32), jnp.asarray(a2, f32)])  # (2,) -> SMEM

    out_k = pl.pallas_call(
        _st_gcn_kernel,
        out_shape=jax.ShapeDtypeStruct((G, T * Co, nb * V), f32),
        grid=(G,),
        in_specs=[
            pl.BlockSpec(memory_space=pltpu.MemorySpace.SMEM),              # alphas
            pl.BlockSpec((None, T * C, nb * T * V), lambda g: (g, 0, 0)),   # xbd
            pl.BlockSpec((None, nb * T * V, nb * V), lambda g: (g, 0, 0)),  # abd
            pl.BlockSpec((None, T * C, nb * V), lambda g: (g, 0, 0)),       # xr
            pl.BlockSpec((2 * T * Co, T * C), lambda g: (0, 0)),            # wbig (const)
            pl.BlockSpec((T * Co, T * Co), lambda g: (0, 0)),               # wband (const)
            pl.BlockSpec((T * Co, 3), lambda g: (0, 0)),                    # rp (const)
        ],
        out_specs=pl.BlockSpec((None, T * Co, nb * V), lambda g: (g, 0, 0)),
        compiler_params=pltpu.CompilerParams(dimension_semantics=("parallel",)),
    )(alphas, xbd, abd, xr, wbig, wband, rp)

    # Back to PyTorch layout (N, Co, T, V).
    out = jnp.transpose(out_k.reshape(G, T, Co, nb, V),
                        (0, 3, 2, 1, 4)).reshape(N, Co, T, V)
    return out, A


def ref_forward(x, A, w0, w1, conv_w, conv_b, bn1, bn2, a1, a2, eps=1e-5):
    """Pure-JAX reference mirroring the PyTorch module (inference-mode BN)."""
    res = x
    H = x
    for W in (w0, w1):
        xa = jnp.einsum('nctv,ntvw->nctw', x, A)     # both layers use the ORIGINAL x
        H = jax.nn.relu(jnp.einsum('nctw,tch->nhtw', xa, W)) + H
    g = H

    gamma1, beta1, mean1, var1 = bn1
    inv1 = gamma1 / jnp.sqrt(var1 + eps)
    y = g * inv1[None, :, None, None] + (beta1 - mean1 * inv1)[None, :, None, None]
    y = jnp.where(y >= 0, y, a1 * y)

    kt = conv_w.shape[-1]
    pad = (kt - 1) // 2
    T = x.shape[2]
    yp = jnp.pad(y, ((0, 0), (0, 0), (pad, pad), (0, 0)))
    conv = sum(jnp.einsum('oc,nctv->notv', conv_w[:, :, dt], yp[:, :, dt:dt + T, :])
               for dt in range(kt))
    conv = conv + conv_b[None, :, None, None]

    gamma2, beta2, mean2, var2 = bn2
    inv2 = gamma2 / jnp.sqrt(var2 + eps)
    z = conv * inv2[None, :, None, None] + (beta2 - mean2 * inv2)[None, :, None, None]
    z = z + res
    return jnp.where(z >= 0, z, a2 * z)


if __name__ == "__main__":
    key = jax.random.PRNGKey(0)
    # T must be 4: the GCN weights are (4, C, H) and are indexed by t in the einsum.
    N, C, T, V = 4, 4, 4, 16
    Co = C            # in_channels == out_channels -> identity residual path
    kt = 3            # temporal kernel (odd), padding = 1
    eps = 1e-5

    ks = jax.random.split(key, 6)
    x = jax.random.normal(ks[0], (N, C, T, V), jnp.float32)
    A = jax.nn.softmax(jax.random.normal(ks[1], (N, T, V, V), jnp.float32), axis=-1)

    # GCN weights (torch.randn init)
    w0 = jax.random.normal(ks[2], (T, C, C), jnp.float32)
    w1 = jax.random.normal(ks[3], (T, C, Co), jnp.float32)

    # Conv2d(out, out, (kt,1)) weight/bias (synthetic init)
    conv_w = jax.random.normal(ks[4], (Co, Co, kt), jnp.float32) * 0.1   # (Cout, Cin, kt)
    conv_b = jax.random.normal(ks[5], (Co,), jnp.float32) * 0.1

    # BatchNorm2d default params / running stats (inference mode)
    bn1 = (jnp.ones((Co,), jnp.float32), jnp.zeros((Co,), jnp.float32),
           jnp.zeros((Co,), jnp.float32), jnp.ones((Co,), jnp.float32))
    bn2 = (jnp.ones((Co,), jnp.float32), jnp.zeros((Co,), jnp.float32),
           jnp.zeros((Co,), jnp.float32), jnp.ones((Co,), jnp.float32))

    # PReLU default alpha (single parameter)
    a1 = jnp.float32(0.25)
    a2 = jnp.float32(0.25)

    out, A_out = st_gcn_forward(x, A, w0, w1, conv_w, conv_b, bn1, bn2, a1, a2,
                                nb=2, eps=eps)
    out = jax.block_until_ready(out)

    ref = ref_forward(x, A, w0, w1, conv_w, conv_b, bn1, bn2, a1, a2, eps)
    assert out.shape == (N, Co, T, V)
    assert bool(jnp.allclose(out, ref, atol=2e-3, rtol=2e-3)), "mismatch vs reference"
    print("KERNEL_OK")
</pallas_src>

<mosaic_0001>
module attributes {stable_mosaic.version = 11 : i64} {
  func.func @_st_gcn_kernel(%arg0: i32, %arg1: memref<2xf32, #tpu.memory_space<smem>>, %arg2: memref<1x16x128xf32, #tpu.memory_space<vmem>>, %arg3: memref<1x128x32xf32, #tpu.memory_space<vmem>>, %arg4: memref<1x16x32xf32, #tpu.memory_space<vmem>>, %arg5: memref<32x16xf32, #tpu.memory_space<vmem>>, %arg6: memref<16x16xf32, #tpu.memory_space<vmem>>, %arg7: memref<16x3xf32, #tpu.memory_space<vmem>>, %arg8: memref<1x16x32xf32, #tpu.memory_space<vmem>>) attributes {dimension_semantics = [#tpu.dimension_semantics<parallel>], iteration_bounds = array<i64: 2>, scalar_prefetch = 0 : i64, scratch_operands = 0 : i64, tpu.core_type = #tpu.core_type<tc>, window_params = [{transform_indices = @transform_0, window_bounds = array<i64: 2>}, {transform_indices = @transform_1, window_bounds = array<i64: 1, 16, 128>}, {transform_indices = @transform_2, window_bounds = array<i64: 1, 128, 32>}, {transform_indices = @transform_3, window_bounds = array<i64: 1, 16, 32>}, {pipeline_mode = #tpu.pipeline_mode<synchronous>, transform_indices = @transform_4, window_bounds = array<i64: 32, 16>}, {pipeline_mode = #tpu.pipeline_mode<synchronous>, transform_indices = @transform_5, window_bounds = array<i64: 16, 16>}, {pipeline_mode = #tpu.pipeline_mode<synchronous>, transform_indices = @transform_6, window_bounds = array<i64: 16, 3>}, {transform_indices = @transform_7, window_bounds = array<i64: 1, 16, 32>}]} {
    %c0 = arith.constant 0 : index
    %c0_0 = arith.constant 0 : index
    %c0_1 = arith.constant 0 : index
    %0 = vector.load %arg2[%c0, %c0_0, %c0_1] : memref<1x16x128xf32, #tpu.memory_space<vmem>>, vector<1x16x128xf32>
    %1 = vector.shape_cast %0 : vector<1x16x128xf32> to vector<16x128xf32>
    %c0_2 = arith.constant 0 : index
    %c0_3 = arith.constant 0 : index
    %c0_4 = arith.constant 0 : index
    %2 = vector.load %arg3[%c0_2, %c0_3, %c0_4] : memref<1x128x32xf32, #tpu.memory_space<vmem>>, vector<1x128x32xf32>
    %3 = vector.shape_cast %2 : vector<1x128x32xf32> to vector<128x32xf32>
    %cst = arith.constant dense<0.000000e+00> : vector<16x32xf32>
    %4 = tpu.matmul %1, %3, %cst {dimension_numbers = #tpu.dot_dimension_numbers<[1], [0], [0], [1], [0, 0, 1, 1], [], []>} : vector<16x128xf32>, vector<128x32xf32>, vector<16x32xf32> -> vector<16x32xf32>
    %c0_5 = arith.constant 0 : index
    %c0_6 = arith.constant 0 : index
    %5 = vector.load %arg5[%c0_5, %c0_6] : memref<32x16xf32, #tpu.memory_space<vmem>>, vector<32x16xf32>
    %cst_7 = arith.constant dense<0.000000e+00> : vector<32x32xf32>
    %6 = tpu.matmul %5, %4, %cst_7 {dimension_numbers = #tpu.dot_dimension_numbers<[1], [0], [0], [1], [0, 0, 1, 1], [], []>} : vector<32x16xf32>, vector<16x32xf32>, vector<32x32xf32> -> vector<32x32xf32>
    %c0_8 = arith.constant 0 : index
    %c0_9 = arith.constant 0 : index
    %c0_10 = arith.constant 0 : index
    %7 = vector.load %arg4[%c0_8, %c0_9, %c0_10] : memref<1x16x32xf32, #tpu.memory_space<vmem>>, vector<1x16x32xf32>
    %8 = vector.shape_cast %7 : vector<1x16x32xf32> to vector<16x32xf32>
    %9 = vector.extract_strided_slice %6 {offsets = [0, 0], sizes = [16, 32], strides = [1, 1]} : vector<32x32xf32> to vector<16x32xf32>
    %cst_11 = arith.constant 0.000000e+00 : f32
    %10 = vector.broadcast %cst_11 : f32 to vector<16x32xf32>
    %11 = arith.maximumf %9, %10 : vector<16x32xf32>
    %12 = vector.extract_strided_slice %6 {offsets = [16, 0], sizes = [16, 32], strides = [1, 1]} : vector<32x32xf32> to vector<16x32xf32>
    %cst_12 = arith.constant 0.000000e+00 : f32
    %13 = vector.broadcast %cst_12 : f32 to vector<16x32xf32>
    %14 = arith.maximumf %12, %13 : vector<16x32xf32>
    %15 = arith.addf %11, %14 : vector<16x32xf32>
    %16 = arith.addf %15, %8 : vector<16x32xf32>
    %c0_13 = arith.constant 0 : index
    %17 = memref.load %arg1[%c0_13] : memref<2xf32, #tpu.memory_space<smem>>
    %c1 = arith.constant 1 : index
    %18 = memref.load %arg1[%c1] : memref<2xf32, #tpu.memory_space<smem>>
    %c0_14 = arith.constant 0 : index
    %c0_15 = arith.constant 0 : index
    %19 = vector.load %arg7[%c0_14, %c0_15] : memref<16x3xf32, #tpu.memory_space<vmem>>, vector<16x1xf32>
    %20 = vector.broadcast %19 : vector<16x1xf32> to vector<16x32xf32>
    %21 = arith.mulf %16, %20 : vector<16x32xf32>
    %c0_16 = arith.constant 0 : index
    %c1_17 = arith.constant 1 : index
    %22 = vector.load %arg7[%c0_16, %c1_17] : memref<16x3xf32, #tpu.memory_space<vmem>>, vector<16x1xf32>
    %23 = vector.broadcast %22 : vector<16x1xf32> to vector<16x32xf32>
    %24 = arith.addf %21, %23 : vector<16x32xf32>
    %cst_18 = arith.constant 0.000000e+00 : f32
    %25 = vector.broadcast %cst_18 : f32 to vector<16x32xf32>
    %26 = arith.cmpf oge, %24, %25 : vector<16x32xf32>
    %27 = vector.broadcast %17 : f32 to vector<16x32xf32>
    %28 = arith.mulf %27, %24 : vector<16x32xf32>
    %29 = arith.select %26, %24, %28 : vector<16x32xi1>, vector<16x32xf32>
    %c0_19 = arith.constant 0 : index
    %c0_20 = arith.constant 0 : index
    %30 = vector.load %arg6[%c0_19, %c0_20] : memref<16x16xf32, #tpu.memory_space<vmem>>, vector<16x16xf32>
    %cst_21 = arith.constant dense<0.000000e+00> : vector<16x32xf32>
    %31 = tpu.matmul %30, %29, %cst_21 {dimension_numbers = #tpu.dot_dimension_numbers<[1], [0], [0], [1], [0, 0, 1, 1], [], []>} : vector<16x16xf32>, vector<16x32xf32>, vector<16x32xf32> -> vector<16x32xf32>
    %c0_22 = arith.constant 0 : index
    %c2 = arith.constant 2 : index
    %32 = vector.load %arg7[%c0_22, %c2] : memref<16x3xf32, #tpu.memory_space<vmem>>, vector<16x1xf32>
    %33 = vector.broadcast %32 : vector<16x1xf32> to vector<16x32xf32>
    %34 = arith.addf %31, %33 : vector<16x32xf32>
    %35 = arith.addf %34, %8 : vector<16x32xf32>
    %cst_23 = arith.constant 0.000000e+00 : f32
    %36 = vector.broadcast %cst_23 : f32 to vector<16x32xf32>
    %37 = arith.cmpf oge, %35, %36 : vector<16x32xf32>
    %38 = vector.broadcast %18 : f32 to vector<16x32xf32>
    %39 = arith.mulf %38, %35 : vector<16x32xf32>
    %40 = arith.select %37, %35, %39 : vector<16x32xi1>, vector<16x32xf32>
    %c0_24 = arith.constant 0 : index
    %c0_25 = arith.constant 0 : index
    %c0_26 = arith.constant 0 : index
    %41 = vector.load %arg8[%c0_24, %c0_25, %c0_26] : memref<1x16x32xf32, #tpu.memory_space<vmem>>, vector<1x16x32xf32>
    %42 = vector.shape_cast %41 : vector<1x16x32xf32> to vector<16x32xf32>
    %43 = vector.shape_cast %40 : vector<16x32xf32> to vector<1x16x32xf32>
    tpu.vector_store %arg8[%c0_24, %c0_25, %c0_26], %43 {strides = array<i32>} : memref<1x16x32xf32, #tpu.memory_space<vmem>>, vector<1x16x32xf32>,
    return
  }
  func.func @transform_0(%arg0: i32) -> i32 {
    %c0_i32 = arith.constant 0 : i32
    %c0_i32_0 = arith.constant 0 : i32
    return %c0_i32 : i32
  }
  func.func @transform_1(%arg0: i32) -> (i32, i32, i32) {
    %c0_i32 = arith.constant 0 : i32
    %c0_i32_0 = arith.constant 0 : i32
    %c0_i32_1 = arith.constant 0 : i32
    return %arg0, %c0_i32, %c0_i32_0 : i32, i32, i32
  }
  func.func @transform_2(%arg0: i32) -> (i32, i32, i32) {
    %c0_i32 = arith.constant 0 : i32
    %c0_i32_0 = arith.constant 0 : i32
    %c0_i32_1 = arith.constant 0 : i32
    return %arg0, %c0_i32, %c0_i32_0 : i32, i32, i32
  }
  func.func @transform_3(%arg0: i32) -> (i32, i32, i32) {
    %c0_i32 = arith.constant 0 : i32
    %c0_i32_0 = arith.constant 0 : i32
    %c0_i32_1 = arith.constant 0 : i32
    return %arg0, %c0_i32, %c0_i32_0 : i32, i32, i32
  }
  func.func @transform_4(%arg0: i32) -> (i32, i32) {
    %c0_i32 = arith.constant 0 : i32
    %c0_i32_0 = arith.constant 0 : i32
    %c0_i32_1 = arith.constant 0 : i32
    return %c0_i32, %c0_i32_0 : i32, i32
  }
  func.func @transform_5(%arg0: i32) -> (i32, i32) {
    %c0_i32 = arith.constant 0 : i32
    %c0_i32_0 = arith.constant 0 : i32
    %c0_i32_1 = arith.constant 0 : i32
    return %c0_i32, %c0_i32_0 : i32, i32
  }
  func.func @transform_6(%arg0: i32) -> (i32, i32) {
    %c0_i32 = arith.constant 0 : i32
    %c0_i32_0 = arith.constant 0 : i32
    %c0_i32_1 = arith.constant 0 : i32
    return %c0_i32, %c0_i32_0 : i32, i32
  }
  func.func @transform_7(%arg0: i32) -> (i32, i32, i32) {
    %c0_i32 = arith.constant 0 : i32
    %c0_i32_0 = arith.constant 0 : i32
    %c0_i32_1 = arith.constant 0 : i32
    return %arg0, %c0_i32, %c0_i32_0 : i32, i32, i32
  }
}

</mosaic_0001>

<bundles_post_ra>
// kernel: tile.26
= control target key start
LH: loop header
LB: loop body
LE: loop exit
PB: predicated region body
PF: predicated region fallthrough
CT: control target
= control target key end

     0   :  { %s22_s0 = inlined_call_operand.vmem [shape: f32[4], index: 0, kind: input, shape index: {}]   ;;  %s23_s1 = inlined_call_operand.vmem [shape: f32[4,4], index: 1, kind: output, shape index: {}]  }
   0x1   :  { %v4_v0 = vld [vmem:[%s22_s0] ss:$0 sm:$0xff] }
   0x2   :  { %5 = vst [vmem:[%s23_s1] sm:$0xf] %v4_v0 }

// kernel: tile.29
= control target key start
LH: loop header
LB: loop body
LE: loop exit
PB: predicated region body
PF: predicated region fallthrough
CT: control target
= control target key end

     0   :  { %vm7_vm0 = vcmask 31744   ;;  %s37_s8 = smov 4   ;;  %s38_s9 = smov 8   ;;  %vm13_vm1 = vcmask 130144   ;;  %vm19_vm2 = vcmask 97344   ;;  %vm25_vm3 = vcmask 64544   ;;  %s55_s0 = inlined_call_operand.vmem [shape: f32[4,4], index: 0, kind: input, shape index: {}]   ;;  %s56_s1 = inlined_call_operand.vmem [shape: f32[16,1], index: 1, kind: output, shape index: {}]  }
   0x1   :  { %v4_v0 = vld [vmem:[%s55_s0] sm:$0xf]  ;;  %s36_s0 = smov 12  }
   0x2   :  { %5 = vst [vmem:[#allocation1] sm:$0xf] %v4_v0 }
   0x9   :  { %v10_v1 = vld [vmem:[#allocation1 + $0x3] sm:$0x1]   ;;  %v22_v2 = vld [vmem:[#allocation1 + $0x1] sm:$0x1]   ;;  %v6_v3 = vld [vmem:[#allocation1] sm:$0x1]  }
   0xa   :  { %11 = vrot.lane.b32.xlu0 %v10_v1, %s36_s0  ;;  %23 = vrot.lane.b32.xlu1 %v22_v2, %s37_s8  ;;  %v16_v4 = vld [vmem:[#allocation1 + $0x2] sm:$0x1]   ;;  %8 = vst.msk [vmem:[#allocation0] sm:$0x1] %vm7_vm0, %v6_v3  }
   0xe   :  { %17 = vrot.lane.b32.xlu0 %v16_v4, %s38_s9 }
  0x7c   :  { %v12_v5 = vpop.permute.xlu0 %11   ;;  %v24_v6 = vpop.permute.xlu1 %23  }
  0x7d   :  { %14 = vst.msk [vmem:[#allocation0] sm:$0x1] %vm13_vm1, %v12_v5  }
  0x80   :  { %v18_v7 = vpop.permute.xlu0 %17  }
  0x81   :  { %20 = vst.msk [vmem:[#allocation0] sm:$0x1] %vm19_vm2, %v18_v7  }
  0x82   :  { %26 = vst.msk [vmem:[#allocation0] sm:$0x1] %vm25_vm3, %v24_v6  }
  0x89   :  { %v30_v8 = vld [vmem:[#allocation0] sm:$0x1] }
  0x8a   :  { %32 = vst [vmem:[%s56_s1] sm:$0x1] %v30_v8 }

// kernel: st_gcn_forward.1
= control target key start
LH: loop header
LB: loop body
LE: loop exit
PB: predicated region body
PF: predicated region fallthrough
CT: control target
= control target key end

     0   :  { %12 = vsyncpa [#allocation3], 0  ;;  %s1010_s24 = smov 0   ;;  %s1104_s0 = inlined_call_operand.vmem [shape: f32[2], index: 0, kind: input, shape index: {}]   ;;  %s1105_s1 = inlined_call_operand.vmem [shape: f32[2,16,128], index: 1, kind: input, shape index: {}]   ;;  %s1106_s2 = inlined_call_operand.vmem [shape: f32[2,128,32], index: 2, kind: input, shape index: {}]   ;;  %s1107_s3 = inlined_call_operand.vmem [shape: f32[2,16,32], index: 3, kind: input, shape index: {}]   ;;  %s1108_s4 = inlined_call_operand.vmem [shape: f32[32,16], index: 4, kind: input, shape index: {}]   ;;  %s1109_s5 = inlined_call_operand.vmem [shape: f32[16,16], index: 5, kind: input, shape index: {}]   ;;  %s1110_s6 = inlined_call_operand.vmem [shape: f32[16,3], index: 6, kind: input, shape index: {}]   ;;  %s1111_s7 = inlined_call_operand.vmem [shape: f32[2,16,32], index: 7, kind: output, shape index: {}]  }
   0x1 LB: > { %s765_s25 = sadd.s32 4294967295, %s964_s24   ;;  %p767_p0 = scmp.ge.s32.totalorder %s964_s24, 1  ;;  %s964_s24 = sphi %s1010_s24, %s18_s24  }
   0x2   : > { %p211_p1 = scmp.lt.s32.totalorder %s964_s24, 3  ;;  %s224_s28 = sshll.u32 %s1104_s0, 4  ;;  %s225_s28 = int_to_ptr.vmem [resolvable:$true] %s224_s28 }
   0x3   : > { %p921_p3 = scmp.eq.s32.totalorder %s765_s25, 0  ;;  %s939_s30 = scalar_lea.vmem %s225_s28, 16 }
   0x4   : > { %p1021_p2 = pnand %p767_p0, %p211_p1  ;;  %p940_p6 = scmp.ne.s32.totalorder %s225_s28, %s939_s30 }
   0x5   : > { %p947_p10 = scmp.lt.s32.totalorder %s225_s28, %s225_s28  ;;  %p948_p11 = scmp.lt.s32.totalorder %s939_s30, %s939_s30 }
   0x6   : > { %p917_p4 = pneg %p1021_p2 }
   0x7   : > { %p949_p12 = por %p948_p11, %p947_p10 }
   0x8   : > { %p918_p5 = pnand %p921_p3, %p917_p4 }
   0xa   : > { %p941_p7 = pneg %p918_p5 }
   0xc   : > { %p942_p8 = pnand %p941_p7, %p940_p6 }
   0xe   : > { %p943_p9 = pneg %p942_p8 }
  0x10   : > { %p950_p13 = pnand %p949_p12, %p943_p9 }
  0x12   : > { %953 = shalt.err (!%p950_p13)
}
  0x13   : > { %s966_s8 = smov [#allocation2]   ;;  %270 = sbr.rel (%p1021_p2) target bundleno = 745 (0x2e9), region = 48 }
  0x14   : > { %920 = dma.vmem_to_smem (!%p918_p5), %s225_s28, 16, %s966_s8, [#allocation3]  }
  0x1a   : > { %959 = dma.done.wait (%p921_p3), [#allocation3], 16  }
  0x1b   : > { %961 = vsyncadd (%p921_p3), [#allocation3], 4294967280 }
  0x1c   : > { %276 = sfence }
  0x1d   : > { %p313_p0 = scmp.lt.s32.totalorder %s765_s25, 1  ;;  %v426_v26 = vld [vmem:[%s1108_s4] sm:$0xff]  ;;  %vm430_vm0 = vcmask 130048   ;;  %v967_v28 = vmov 0   ;;  %v968_v29 = vmov 1   ;;  %v541_v30 = vld [vmem:[%s1110_s6 + $0x8] sm:$0xff] }
  0x1e   : > { %860 = vmatprep.mubr.msk.f32.mxu1 %vm430_vm0, %v426_v26  ;;  %v540_v27 = vld [vmem:[%s1110_s6] sm:$0xff]  ;;  %935 = vset.pattern.permute.xlu0 %v967_v28  ;;  %v427_v34 = vld [vmem:[%s1108_s4 + $0x8] sm:$0xff]  ;;  %v428_v35 = vld [vmem:[%s1108_s4 + $0x10] sm:$0xff]  ;;  %v969_v38 = vmov 2   ;;  %vm671_vm3 = vcmask 261120  }
  0x1f   : > { %s1114_s25 = smov (!%p313_p0, %s765_s25), 1  ;;  %936 = vset.pattern.permute.xlu1 %v968_v29  ;;  %544 = vperm.xlu0 %935, %v540_v27   ;;  %v429_v36 = vld [vmem:[%s1108_s4 + $0x18] sm:$0xff]  ;;  %v571_v37 = vld [vmem:[%s1109_s5] sm:$0xff] }
  0x20   : > { %s790_s9 = sshll.u32 %s1114_s25, 7  ;;  %s1037_s13 = sshll.u32 %s1114_s25, 4  ;;  %555 = vperm.xlu1 %936, %v540_v27  }
  0x21   : > { %s1035_s12 = scalar_lea.vmem %s1106_s2, %s790_s9  ;;  %s1049_s16 = scalar_lea.vmem %s1105_s1, %s1037_s13 }
  0x22   : > { %v335_v0 = vld [vmem:[%s1035_s12] sm:$0xff]  ;;  %v336_v1 = vld [vmem:[%s1035_s12 + $0x8] sm:$0xff]  ;;  %v337_v2 = vld [vmem:[%s1035_s12 + $0x10] sm:$0xff]  ;;  %s327_s11 = scalar_lea.vmem %s1107_s3, %s1037_s13  ;;  %s332_s19 = scalar_lea.vmem %s1111_s7, %s1037_s13 }
  0x23   : > { %v873_v3 = vpack.c.bf16 %v336_v1, %v335_v0  ;;  %v338_v4 = vld [vmem:[%s1035_s12 + $0x18] sm:$0xff]  ;;  %v339_v6 = vld [vmem:[%s1035_s12 + $0x20] sm:$0xff]  ;;  %v340_v7 = vld [vmem:[%s1035_s12 + $0x28] sm:$0xff]  ;;  %549 = vperm.xlu0 %935, %v541_v30  }
  0x24   : > { %v877_v5 = vpack.c.bf16 %v338_v4, %v337_v2  ;;  %v881_v8 = vpack.c.bf16 %v340_v7, %v339_v6  ;;  %v333_v9 = vld [vmem:[%s1049_s16] sm:$0xff]  ;;  %v341_v10 = vld [vmem:[%s1035_s12 + $0x30] sm:$0xff]  ;;  %v342_v11 = vld [vmem:[%s1035_s12 + $0x38] sm:$0xff]  ;;  %559 = vperm.xlu1 %936, %v541_v30  }
  0x25   : > { %874 = vmatprep.subr.bf16.mxu0 %v873_v3  ;;  %853 = vmatprep.mubr.f32.mxu0 %v333_v9  ;;  %v885_v12 = vpack.c.bf16 %v342_v11, %v341_v10  ;;  %v343_v13 = vld [vmem:[%s1035_s12 + $0x40] sm:$0xff]  ;;  %v344_v14 = vld [vmem:[%s1035_s12 + $0x48] sm:$0xff]  ;;  %v345_v16 = vld [vmem:[%s1035_s12 + $0x50] sm:$0xff] }
  0x26   : > { %876 = vmatpush3.bf16.msra.mxu0 %v873_v3  ;;  %v889_v15 = vpack.c.bf16 %v344_v14, %v343_v13  ;;  %v346_v17 = vld [vmem:[%s1035_s12 + $0x58] sm:$0xff]  ;;  %v347_v19 = vld [vmem:[%s1035_s12 + $0x60] sm:$0xff]  ;;  %v348_v20 = vld [vmem:[%s1035_s12 + $0x68] sm:$0xff] }
  0x27   : > { %878 = vmatprep.subr.bf16.mxu0 %v877_v5  ;;  %v893_v18 = vpack.c.bf16 %v346_v17, %v345_v16  ;;  %v897_v21 = vpack.c.bf16 %v348_v20, %v347_v19  ;;  %v349_v22 = vld [vmem:[%s1035_s12 + $0x70] sm:$0xff]  ;;  %v350_v23 = vld [vmem:[%s1035_s12 + $0x78] sm:$0xff]  ;;  %v334_v25 = vld [vmem:[%s1049_s16 + $0x8] sm:$0xff]  ;;  %937 = vset.pattern.permute.xlu0 %v969_v38  ;;  %s538_s12 = sld [smem:[#allocation2]]  ;;  %s784_s16 = sld [smem:[#allocation2 + $0x1]] }
  0x28   : > { %v901_v24 = vpack.c.bf16 %v350_v23, %v349_v22  ;;  %938 = vset.pattern.permute.xlu1 %v969_v38  ;;  %574 = vperm.xlu0 %937, %v540_v27   ;;  %v529_v49 = vld [vmem:[%s327_s11 + $0x8] sm:$0xff]  ;;  %v528_v51 = vld [vmem:[%s327_s11] sm:$0xff] }
  0x29   : > { %578 = vperm.xlu1 %938, %v541_v30   ;;  %v572_v3 = vld [vmem:[%s1109_s5 + $0x8] sm:$0xff] }
  0x2a   : > { %880 = vmatpush3.bf16.msra.mxu0 %v877_v5 }
  0x2b   : > { %882 = vmatprep.subr.bf16.mxu0 %v881_v8 }
  0x2d   : > { %v566_v59 = vstv %s538_s12  ;;  %v666_v9 = vstv %s784_s16 }
  0x2e   : > { %884 = vmatpush3.bf16.msra.mxu0 %v881_v8 }
  0x2f   : > { %886 = vmatprep.subr.bf16.mxu0 %v885_v12 }
  0x32   : > { %888 = vmatpush3.bf16.msra.mxu0 %v885_v12 }
  0x33   : > { %890 = vmatprep.subr.bf16.mxu0 %v889_v15 }
  0x36   : > { %892 = vmatpush3.bf16.msra.mxu0 %v889_v15 }
  0x37   : > { %894 = vmatprep.subr.bf16.mxu0 %v893_v18 }
  0x3a   : > { %896 = vmatpush3.bf16.msra.mxu0 %v893_v18 }
  0x3b   : > { %898 = vmatprep.subr.bf16.mxu0 %v897_v21 }
  0x3e   : > { %900 = vmatpush3.bf16.msra.mxu0 %v897_v21 }
  0x3f   : > { %902 = vmatprep.subr.bf16.mxu0 %v901_v24 }
  0x42   : > { %904 = vmatpush3.bf16.msra.mxu0 %v901_v24 }
  0x45   : > { %854 = vmatmul.mubr.f32.vlgmr.msra.gmra.mrb[0].mxu0 %v334_v25 }
  0x9e   : > { %v545_v41 = vpop.permute.xlu0 %544 }
  0x9f   : > { %v556_v47 = vpop.permute.xlu1 %555 }
  0xa2   : > { %v550_v55 = vpop.permute.xlu0 %549 }
  0xa3   : > { %v560_v58 = vpop.permute.xlu1 %559 }
  0xa7   : > { %v575_v5 = vpop.permute.xlu0 %574 }
  0xa8   : > { %v579_v4 = vpop.permute.xlu1 %578 }
 0x118   : > { %v855_v31 = vpop.f32.mrb[0].mxu0 }
 0x119   : > { %v417_v32 = vpop.f32.mrb[1].mxu0 }
 0x11a   : > { %v905_v33 = vpack.c.bf16 %v855_v31, %v417_v32 }
 0x11c   : > { %906 = vmatprep.subr.bf16.mxu1 %v905_v33 }
 0x11d   : > { %908 = vmatpush3.bf16.msra.mxu1 %v905_v33 }
 0x120   : > { %861 = vmatmul.mubr.msk.f32.vlgmr.msra.gmra.mrb[0].mxu1 %vm430_vm0, %v427_v34 }
 0x121   : > { %863 = vmatprep.mubr.msk.f32.mxu1 %vm430_vm0, %v428_v35 }
 0x124   : > { %864 = vmatmul.mubr.msk.f32.gmra.mrb[2].mxu1 %vm430_vm0, %v429_v36 }
 0x125   : > { %870 = vmatprep.mubr.msk.f32.mxu1 %vm430_vm0, %v571_v37 }
 0x1f3   : > { %v862_v39 = vpop.f32.mrb[0].mxu1 }
 0x1f4   : > { %v509_v40 = vpop.f32.mrb[1].mxu1  ;;  %v531_v43 = vmax.f32 %v862_v39, 0.0 }
 0x1f5   : > { %v530_v46 = vmax.f32 %v509_v40, 0.0 }
 0x1f7   : > { %v865_v42 = vpop.f32.mrb[2].mxu1 }
 0x1f8   : > { %v533_v44 = vmax.f32 %v865_v42, 0.0  ;;  %v519_v45 = vpop.f32.mrb[3].mxu1 }
 0x1f9   : > { %v532_v48 = vmax.f32 %v519_v45, 0.0 }
 0x1fa   : > { %v535_v50 = vadd.f32 %v533_v44, %v531_v43 }
 0x1fb   : > { %v534_v52 = vadd.f32 %v532_v48, %v530_v46 }
 0x1fc   : > { %v537_v53 = vadd.f32 %v535_v50, %v529_v49 }
 0x1fd   : > { %v536_v54 = vadd.f32 %v534_v52, %v528_v51 }
 0x1fe   : > { %v553_v56 = vmul.f32 %v550_v55, %v537_v53 }
 0x1ff   : > { %v552_v57 = vmul.f32 %v545_v41, %v536_v54 }
 0x200   : > { %v563_v60 = vadd.f32 %v560_v58, %v553_v56 }
 0x201   : > { %v562_v61 = vadd.f32 %v556_v47, %v552_v57 }
 0x202   : > { %vm565_vm1 = vcmp.ge.f32.partialorder %v563_v60, 0.0  ;;  %v568_v62 = vmul.f32 %v566_v59, %v563_v60 }
 0x203   : > { %v567_v63 = vmul.f32 %v566_v59, %v562_v61  ;;  %vm564_vm2 = vcmp.ge.f32.partialorder %v562_v61, 0.0 }
 0x204   : > { %v570_v0 = vsel %vm565_vm1, %v563_v60, %v568_v62 }
 0x205   : > { %v569_v1 = vsel %vm564_vm2, %v562_v61, %v567_v63 }
 0x206   : > { %v909_v2 = vpack.c.bf16 %v570_v0, %v569_v1 }
 0x208   : > { %910 = vmatprep.subr.bf16.mxu1 %v909_v2 }
 0x209   : > { %912 = vmatpush3.bf16.msra.mxu1 %v909_v2 }
 0x20c   : > { %871 = vmatmul.mubr.msk.f32.vlgmr.msra.gmra.mrb[4].mxu1 %vm430_vm0, %v572_v3 }
 0x2df   : > { %v872_v6 = vpop.f32.mrb[4].mxu1 }
 0x2e0   : > { %v659_v7 = vadd.f32 %v872_v6, %v579_v4  ;;  %v653_v8 = vpop.f32.mrb[5].mxu1 }
 0x2e1   : > { %v654_v10 = vadd.f32 %v653_v8, %v575_v5 }
 0x2e2   : > { %v663_v11 = vadd.f32 %v659_v7, %v529_v49 }
 0x2e3   : > { %v662_v12 = vadd.f32 %v654_v10, %v528_v51 }
 0x2e4   : > { %vm665_vm4 = vcmp.ge.f32.partialorder %v663_v11, 0.0  ;;  %v668_v13 = vmul.f32 %v666_v9, %v663_v11 }
 0x2e5   : > { %vm664_vm5 = vcmp.ge.f32.partialorder %v662_v12, 0.0  ;;  %v667_v14 = vmul.f32 %v666_v9, %v662_v12 }
 0x2e6   : > { %v670_v15 = vsel %vm665_vm4, %v663_v11, %v668_v13 }
 0x2e7   : > { %673 = vst.msk [vmem:[%s332_s19 + $0x8] sm:$0xff] %vm671_vm3, %v670_v15  ;;  %v669_v16 = vsel %vm664_vm5, %v662_v12, %v667_v14 }
 0x2e8   : > { %672 = vst.msk [vmem:[%s332_s19] sm:$0xff] %vm671_vm3, %v669_v16 }
 0x2e9 PF: > { %s18_s24 = sadd.s32 1, %s964_s24  }
 0x2ea   : > { %p15_p1 = scmp.ge.s32.totalorder %s18_s24, 4  }
 0x2ec   :  { %17 = sbr.rel (!%p15_p1) target bundleno = 1 (0x1), region = 89 }
 0x2f3   :  { %695 = vsyncpa [#allocation3], 1 }
 0x2f4   :  { %697 = vsyncpa [#allocation3 + $0x1], 1 }

</bundles_post_ra>
